<compile_context>
chip_gen: v7x
topology: tpu7x:2x2x1
jax: 0.10.0
libtpu: 0.0.40
codegen_flags: <defaults>
</compile_context>

<pallas_src>
import jax
import jax.numpy as jnp
from jax import lax
from jax.experimental import pallas as pl
from jax.experimental.pallas import tpu as pltpu

EMB_DIM = 50
DICT_SIZE = 53 + 3 + 16          # 72
LANE = 128
SUBLANE = 8
DICT_PAD = 128                   # round_up(DICT_SIZE, LANE)


def _round_up(n, m):
    return (n + m - 1) // m * m


# --------------------------------------------------------------------------
# Kernel
# --------------------------------------------------------------------------
def actor_kernel(tok_ref, w_ref, bias_ref, o_ref):
    """Fused (embedding @ W1) + 5 further residual-MLP layers.

    tok_ref  : (B_BLK, L)              int32  VMEM  token ids (padded batch)
    w_ref    : (L*DICT_PAD + 5*P, P)   bf16   VMEM  [EW1 | W2..W6] slab
    bias_ref : (6, P)                  f32    VMEM  b1..b6 zero-padded
    o_ref    : (B_BLK, P)              f32    VMEM  padded logits (lane dense)
    """
    b_blk, seq_len = tok_ref.shape
    p = o_ref.shape[1]
    l_total = seq_len * DICT_PAD     # contraction width of the folded layer 1

    # Fused one-hot over all positions, built directly in bf16:
    #   onehot[b, l*DICT_PAD + t] = 1  iff  tok[b, l] == t
    tok = tok_ref[...]
    col = lax.broadcasted_iota(jnp.int32, (b_blk, l_total), 1)
    onehot = jnp.zeros((b_blk, l_total), jnp.bfloat16)
    for l in range(seq_len):
        shifted = tok[:, l:l + 1] + (l * DICT_PAD)           # (B, 1) int32
        onehot = onehot + (col == shifted).astype(jnp.bfloat16)

    # Embedding gather + hidden_layer1 in one MXU pass (K = L*DICT_PAD).
    acc = jnp.dot(onehot, w_ref[0:l_total, :],
                  preferred_element_type=jnp.float32)         # (B, P) f32

    def dense(x, layer):
        start = l_total + layer * p
        w = w_ref[start:start + p, :]                          # (P, P) bf16
        b = bias_ref[layer + 1:layer + 2, :]                   # (1, P) f32
        return jnp.dot(x.astype(jnp.bfloat16), w,
                       preferred_element_type=jnp.float32) + b

    x1 = jnp.maximum(acc + bias_ref[0:1, :], 0.0)              # (B, 4H)
    x2 = jnp.maximum(dense(x1, 0), 0.0)                        # (B, 2H)
    x3 = jnp.maximum(dense(x2, 1), 0.0)                        # (B,  H)
    x4 = jnp.maximum(dense(x3, 2) + x2, 0.0)                   # (B, 2H)
    x5 = jnp.maximum(dense(x4, 3) + x1, 0.0)                   # (B, 4H)
    o_ref[...] = dense(x5, 4)                                  # (B,  A)


# --------------------------------------------------------------------------
# Parameter construction / packing
# --------------------------------------------------------------------------
def init_actor_params(key, input_size, hidden_size, n_actions):
    """Logical parameters with the exact PyTorch module shapes (f32)."""
    dims_in = [input_size * EMB_DIM, hidden_size * 4, hidden_size * 2,
               hidden_size, hidden_size * 2, hidden_size * 4]
    dims_out = [hidden_size * 4, hidden_size * 2, hidden_size,
                hidden_size * 2, hidden_size * 4, n_actions]
    keys = jax.random.split(key, 1 + 2 * len(dims_in))
    params = {"embedding": jax.random.normal(keys[0], (DICT_SIZE, EMB_DIM),
                                             jnp.float32)}
    for i, (din, dout) in enumerate(zip(dims_in, dims_out)):
        bound = 1.0 / float(din) ** 0.5
        params[f"w{i + 1}"] = jax.random.uniform(
            keys[1 + 2 * i], (din, dout), jnp.float32, -bound, bound)
        params[f"b{i + 1}"] = jax.random.uniform(
            keys[2 + 2 * i], (dout,), jnp.float32, -bound, bound)
    return params


def make_padded_params(params, input_size, hidden_size, n_actions):
    """Fold E into W1, zero-pad lane-dense, pack everything into one slab."""
    seq_len = input_size
    h4 = hidden_size * 4
    p = _round_up(max(h4, n_actions), LANE)

    # EW1[l, t, :] = E[t, :] @ W1[l, :, :]   (computed in f32, cast once)
    w1 = params["w1"].reshape(seq_len, EMB_DIM, h4)
    ew1 = jnp.einsum("te,led->ltd", params["embedding"], w1)   # (L, 72, 4H) f32
    ew1 = jnp.pad(ew1, ((0, 0), (0, DICT_PAD - DICT_SIZE), (0, p - h4)))
    ew1 = ew1.reshape(seq_len * DICT_PAD, p)

    def pad2(a):
        return jnp.pad(a, ((0, p - a.shape[0]), (0, p - a.shape[1])))

    # Single bf16 weight slab: [EW1 | W2 | W3 | W4 | W5 | W6]
    # TODO(synk): on v7x an fp8 weight slab would halve DMA bytes (gate on
    # accuracy); kept bf16 here for v5e/v6e portability.
    wslab = jnp.concatenate(
        [ew1] + [pad2(params[f"w{i}"]) for i in range(2, 7)], axis=0)
    wslab = wslab.astype(jnp.bfloat16)

    biases = jnp.stack(
        [jnp.pad(params[f"b{i}"], (0, p - params[f"b{i}"].shape[0]))
         for i in range(1, 7)]).astype(jnp.float32)

    return {"wslab": wslab, "biases": biases}


# --------------------------------------------------------------------------
# Forward wrappers
# --------------------------------------------------------------------------
def actor_forward(kparams, tokens, n_actions):
    """tokens: (B, L) int32 in [0, DICT_SIZE). Returns (B, n_actions) f32."""
    b, seq_len = tokens.shape
    wslab = kparams["wslab"]
    biases = kparams["biases"]
    p = wslab.shape[-1]
    wrows = wslab.shape[0]
    l_total = seq_len * DICT_PAD

    # Batch block: fill MXU M once there is work (256-multiples for v6e/v7x),
    # capped at 512 rows to stay well inside v7x's smaller VMEM.
    if b >= 512:
        b_blk = 512
    elif b >= 256:
        b_blk = 256
    else:
        b_blk = _round_up(max(b, SUBLANE), SUBLANE)
    b_pad = _round_up(b, b_blk)
    nb = b_pad // b_blk
    tok = jnp.pad(tokens.astype(jnp.int32), ((0, b_pad - b), (0, 0)))

    flops = 2 * b_pad * (l_total * p + 5 * p * p)
    bytes_accessed = (tok.size * 4 + wslab.size * 2 + biases.size * 4
                      + b_pad * p * 4)

    out_pad = pl.pallas_call(
        actor_kernel,
        out_shape=jax.ShapeDtypeStruct((b_pad, p), jnp.float32),
        grid=(nb,),
        in_specs=[
            pl.BlockSpec((b_blk, seq_len), lambda i: (i, 0)),
            # Constant index_map -> weights/biases stay VMEM-resident.
            pl.BlockSpec((wrows, p), lambda i: (0, 0)),
            pl.BlockSpec((6, p), lambda i: (0, 0)),
        ],
        out_specs=pl.BlockSpec((b_blk, p), lambda i: (i, 0)),
        compiler_params=pltpu.CompilerParams(
            dimension_semantics=("parallel",)),
        cost_estimate=pl.CostEstimate(flops=flops, transcendentals=0,
                                      bytes_accessed=bytes_accessed),
    )(tok, wslab, biases)
    return out_pad[:b, :n_actions]


def actor_forward_ref(params, tokens):
    """Pure-JAX f32 reference with the original module's semantics."""
    b, _ = tokens.shape
    x = jnp.take(params["embedding"], tokens, axis=0).reshape(b, -1)
    x1 = jax.nn.relu(x @ params["w1"] + params["b1"])
    x2 = jax.nn.relu(x1 @ params["w2"] + params["b2"])
    x3 = jax.nn.relu(x2 @ params["w3"] + params["b3"])
    x4 = jax.nn.relu(x3 @ params["w4"] + params["b4"] + x2)
    x5 = jax.nn.relu(x4 @ params["w5"] + params["b5"] + x1)
    return x5 @ params["w6"] + params["b6"]


# TODO(synk): Actor.save() (torch file I/O) and the training-side optimizer /
# Categorical sampling are outside the forward pass and are not translated.

if __name__ == "__main__":
    batch = 2
    input_size = 8        # sequence length of token ids
    hidden_size = 32
    n_actions = 4

    key = jax.random.PRNGKey(0)
    key_params, key_tokens = jax.random.split(key)

    params = init_actor_params(key_params, input_size, hidden_size, n_actions)
    tokens = jax.random.randint(key_tokens, (batch, input_size), 0, DICT_SIZE,
                                dtype=jnp.int32)
    kparams = make_padded_params(params, input_size, hidden_size, n_actions)

    fwd = jax.jit(actor_forward, static_argnums=(2,))
    out = jax.block_until_ready(fwd(kparams, tokens, n_actions))
    ref = jax.block_until_ready(actor_forward_ref(params, tokens))

    assert out.shape == (batch, n_actions)
    assert jnp.allclose(out, ref, atol=1e-2, rtol=1e-2), (
        f"max |diff| = {jnp.max(jnp.abs(out - ref))}")

    print("KERNEL_OK")
</pallas_src>

<mosaic_0001>
module attributes {stable_mosaic.version = 11 : i64} {
  func.func @actor_kernel(%arg0: i32, %arg1: memref<8x8xi32, #tpu.memory_space<vmem>>, %arg2: memref<1664x128xbf16, #tpu.memory_space<vmem>>, %arg3: memref<6x128xf32, #tpu.memory_space<vmem>>, %arg4: memref<8x128xf32, #tpu.memory_space<vmem>>) attributes {dimension_semantics = [#tpu.dimension_semantics<parallel>], iteration_bounds = array<i64: 1>, scalar_prefetch = 0 : i64, scratch_operands = 0 : i64, tpu.core_type = #tpu.core_type<tc>, window_params = [{transform_indices = @transform_0, window_bounds = array<i64: 8, 8>}, {pipeline_mode = #tpu.pipeline_mode<synchronous>, transform_indices = @transform_1, window_bounds = array<i64: 1664, 128>}, {pipeline_mode = #tpu.pipeline_mode<synchronous>, transform_indices = @transform_2, window_bounds = array<i64: 6, 128>}, {transform_indices = @transform_3, window_bounds = array<i64: 8, 128>}]} {
    %c0 = arith.constant 0 : index
    %c0_0 = arith.constant 0 : index
    %0 = vector.load %arg1[%c0, %c0_0] : memref<8x8xi32, #tpu.memory_space<vmem>>, vector<8x8xi32>
    %1 = tpu.iota {dimensions = array<i32: 1>} : vector<8x1024xi32>
    %cst = arith.constant 0.000000e+00 : bf16
    %2 = vector.broadcast %cst : bf16 to vector<8x1024xbf16>
    %3 = vector.extract_strided_slice %0 {offsets = [0, 0], sizes = [8, 1], strides = [1, 1]} : vector<8x8xi32> to vector<8x1xi32>
    %c0_i32 = arith.constant 0 : i32
    %4 = vector.broadcast %c0_i32 : i32 to vector<8x1xi32>
    %5 = arith.addi %3, %4 : vector<8x1xi32>
    %6 = vector.broadcast %5 : vector<8x1xi32> to vector<8x1024xi32>
    %7 = arith.cmpi eq, %1, %6 : vector<8x1024xi32>
    %8 = arith.extui %7 : vector<8x1024xi1> to vector<8x1024xi32>
    %9 = arith.sitofp %8 : vector<8x1024xi32> to vector<8x1024xf32>
    %10 = arith.truncf %9 : vector<8x1024xf32> to vector<8x1024xbf16>
    %11 = arith.addf %2, %10 : vector<8x1024xbf16>
    %12 = vector.extract_strided_slice %0 {offsets = [0, 1], sizes = [8, 1], strides = [1, 1]} : vector<8x8xi32> to vector<8x1xi32>
    %c128_i32 = arith.constant 128 : i32
    %13 = vector.broadcast %c128_i32 : i32 to vector<8x1xi32>
    %14 = arith.addi %12, %13 : vector<8x1xi32>
    %15 = vector.broadcast %14 : vector<8x1xi32> to vector<8x1024xi32>
    %16 = arith.cmpi eq, %1, %15 : vector<8x1024xi32>
    %17 = arith.extui %16 : vector<8x1024xi1> to vector<8x1024xi32>
    %18 = arith.sitofp %17 : vector<8x1024xi32> to vector<8x1024xf32>
    %19 = arith.truncf %18 : vector<8x1024xf32> to vector<8x1024xbf16>
    %20 = arith.addf %11, %19 : vector<8x1024xbf16>
    %21 = vector.extract_strided_slice %0 {offsets = [0, 2], sizes = [8, 1], strides = [1, 1]} : vector<8x8xi32> to vector<8x1xi32>
    %c256_i32 = arith.constant 256 : i32
    %22 = vector.broadcast %c256_i32 : i32 to vector<8x1xi32>
    %23 = arith.addi %21, %22 : vector<8x1xi32>
    %24 = vector.broadcast %23 : vector<8x1xi32> to vector<8x1024xi32>
    %25 = arith.cmpi eq, %1, %24 : vector<8x1024xi32>
    %26 = arith.extui %25 : vector<8x1024xi1> to vector<8x1024xi32>
    %27 = arith.sitofp %26 : vector<8x1024xi32> to vector<8x1024xf32>
    %28 = arith.truncf %27 : vector<8x1024xf32> to vector<8x1024xbf16>
    %29 = arith.addf %20, %28 : vector<8x1024xbf16>
    %30 = vector.extract_strided_slice %0 {offsets = [0, 3], sizes = [8, 1], strides = [1, 1]} : vector<8x8xi32> to vector<8x1xi32>
    %c384_i32 = arith.constant 384 : i32
    %31 = vector.broadcast %c384_i32 : i32 to vector<8x1xi32>
    %32 = arith.addi %30, %31 : vector<8x1xi32>
    %33 = vector.broadcast %32 : vector<8x1xi32> to vector<8x1024xi32>
    %34 = arith.cmpi eq, %1, %33 : vector<8x1024xi32>
    %35 = arith.extui %34 : vector<8x1024xi1> to vector<8x1024xi32>
    %36 = arith.sitofp %35 : vector<8x1024xi32> to vector<8x1024xf32>
    %37 = arith.truncf %36 : vector<8x1024xf32> to vector<8x1024xbf16>
    %38 = arith.addf %29, %37 : vector<8x1024xbf16>
    %39 = vector.extract_strided_slice %0 {offsets = [0, 4], sizes = [8, 1], strides = [1, 1]} : vector<8x8xi32> to vector<8x1xi32>
    %c512_i32 = arith.constant 512 : i32
    %40 = vector.broadcast %c512_i32 : i32 to vector<8x1xi32>
    %41 = arith.addi %39, %40 : vector<8x1xi32>
    %42 = vector.broadcast %41 : vector<8x1xi32> to vector<8x1024xi32>
    %43 = arith.cmpi eq, %1, %42 : vector<8x1024xi32>
    %44 = arith.extui %43 : vector<8x1024xi1> to vector<8x1024xi32>
    %45 = arith.sitofp %44 : vector<8x1024xi32> to vector<8x1024xf32>
    %46 = arith.truncf %45 : vector<8x1024xf32> to vector<8x1024xbf16>
    %47 = arith.addf %38, %46 : vector<8x1024xbf16>
    %48 = vector.extract_strided_slice %0 {offsets = [0, 5], sizes = [8, 1], strides = [1, 1]} : vector<8x8xi32> to vector<8x1xi32>
    %c640_i32 = arith.constant 640 : i32
    %49 = vector.broadcast %c640_i32 : i32 to vector<8x1xi32>
    %50 = arith.addi %48, %49 : vector<8x1xi32>
    %51 = vector.broadcast %50 : vector<8x1xi32> to vector<8x1024xi32>
    %52 = arith.cmpi eq, %1, %51 : vector<8x1024xi32>
    %53 = arith.extui %52 : vector<8x1024xi1> to vector<8x1024xi32>
    %54 = arith.sitofp %53 : vector<8x1024xi32> to vector<8x1024xf32>
    %55 = arith.truncf %54 : vector<8x1024xf32> to vector<8x1024xbf16>
    %56 = arith.addf %47, %55 : vector<8x1024xbf16>
    %57 = vector.extract_strided_slice %0 {offsets = [0, 6], sizes = [8, 1], strides = [1, 1]} : vector<8x8xi32> to vector<8x1xi32>
    %c768_i32 = arith.constant 768 : i32
    %58 = vector.broadcast %c768_i32 : i32 to vector<8x1xi32>
    %59 = arith.addi %57, %58 : vector<8x1xi32>
    %60 = vector.broadcast %59 : vector<8x1xi32> to vector<8x1024xi32>
    %61 = arith.cmpi eq, %1, %60 : vector<8x1024xi32>
    %62 = arith.extui %61 : vector<8x1024xi1> to vector<8x1024xi32>
    %63 = arith.sitofp %62 : vector<8x1024xi32> to vector<8x1024xf32>
    %64 = arith.truncf %63 : vector<8x1024xf32> to vector<8x1024xbf16>
    %65 = arith.addf %56, %64 : vector<8x1024xbf16>
    %66 = vector.extract_strided_slice %0 {offsets = [0, 7], sizes = [8, 1], strides = [1, 1]} : vector<8x8xi32> to vector<8x1xi32>
    %c896_i32 = arith.constant 896 : i32
    %67 = vector.broadcast %c896_i32 : i32 to vector<8x1xi32>
    %68 = arith.addi %66, %67 : vector<8x1xi32>
    %69 = vector.broadcast %68 : vector<8x1xi32> to vector<8x1024xi32>
    %70 = arith.cmpi eq, %1, %69 : vector<8x1024xi32>
    %71 = arith.extui %70 : vector<8x1024xi1> to vector<8x1024xi32>
    %72 = arith.sitofp %71 : vector<8x1024xi32> to vector<8x1024xf32>
    %73 = arith.truncf %72 : vector<8x1024xf32> to vector<8x1024xbf16>
    %74 = arith.addf %65, %73 : vector<8x1024xbf16>
    %c0_1 = arith.constant 0 : index
    %c0_2 = arith.constant 0 : index
    %75 = vector.load %arg2[%c0_1, %c0_2] : memref<1664x128xbf16, #tpu.memory_space<vmem>>, vector<1024x128xbf16>
    %cst_3 = arith.constant dense<0.000000e+00> : vector<8x128xf32>
    %76 = tpu.matmul %74, %75, %cst_3 {dimension_numbers = #tpu.dot_dimension_numbers<[1], [0], [0], [1], [0, 0, 1, 1], [], []>} : vector<8x1024xbf16>, vector<1024x128xbf16>, vector<8x128xf32> -> vector<8x128xf32>
    %c0_4 = arith.constant 0 : index
    %c0_5 = arith.constant 0 : index
    %77 = vector.load %arg3[%c0_4, %c0_5] : memref<6x128xf32, #tpu.memory_space<vmem>>, vector<1x128xf32>
    %78 = vector.broadcast %77 : vector<1x128xf32> to vector<8x128xf32>
    %79 = arith.addf %76, %78 : vector<8x128xf32>
    %cst_6 = arith.constant 0.000000e+00 : f32
    %80 = vector.broadcast %cst_6 : f32 to vector<8x128xf32>
    %81 = arith.maximumf %79, %80 : vector<8x128xf32>
    %c1024 = arith.constant 1024 : index
    %c0_7 = arith.constant 0 : index
    %82 = vector.load %arg2[%c1024, %c0_7] : memref<1664x128xbf16, #tpu.memory_space<vmem>>, vector<128x128xbf16>
    %c1 = arith.constant 1 : index
    %c0_8 = arith.constant 0 : index
    %83 = vector.load %arg3[%c1, %c0_8] : memref<6x128xf32, #tpu.memory_space<vmem>>, vector<1x128xf32>
    %84 = arith.truncf %81 : vector<8x128xf32> to vector<8x128xbf16>
    %cst_9 = arith.constant dense<0.000000e+00> : vector<8x128xf32>
    %85 = tpu.matmul %84, %82, %cst_9 {dimension_numbers = #tpu.dot_dimension_numbers<[1], [0], [0], [1], [0, 0, 1, 1], [], []>} : vector<8x128xbf16>, vector<128x128xbf16>, vector<8x128xf32> -> vector<8x128xf32>
    %86 = vector.broadcast %83 : vector<1x128xf32> to vector<8x128xf32>
    %87 = arith.addf %85, %86 : vector<8x128xf32>
    %cst_10 = arith.constant 0.000000e+00 : f32
    %88 = vector.broadcast %cst_10 : f32 to vector<8x128xf32>
    %89 = arith.maximumf %87, %88 : vector<8x128xf32>
    %c1152 = arith.constant 1152 : index
    %c0_11 = arith.constant 0 : index
    %90 = vector.load %arg2[%c1152, %c0_11] : memref<1664x128xbf16, #tpu.memory_space<vmem>>, vector<128x128xbf16>
    %c2 = arith.constant 2 : index
    %c0_12 = arith.constant 0 : index
    %91 = vector.load %arg3[%c2, %c0_12] : memref<6x128xf32, #tpu.memory_space<vmem>>, vector<1x128xf32>
    %92 = arith.truncf %89 : vector<8x128xf32> to vector<8x128xbf16>
    %cst_13 = arith.constant dense<0.000000e+00> : vector<8x128xf32>
    %93 = tpu.matmul %92, %90, %cst_13 {dimension_numbers = #tpu.dot_dimension_numbers<[1], [0], [0], [1], [0, 0, 1, 1], [], []>} : vector<8x128xbf16>, vector<128x128xbf16>, vector<8x128xf32> -> vector<8x128xf32>
    %94 = vector.broadcast %91 : vector<1x128xf32> to vector<8x128xf32>
    %95 = arith.addf %93, %94 : vector<8x128xf32>
    %cst_14 = arith.constant 0.000000e+00 : f32
    %96 = vector.broadcast %cst_14 : f32 to vector<8x128xf32>
    %97 = arith.maximumf %95, %96 : vector<8x128xf32>
    %c1280 = arith.constant 1280 : index
    %c0_15 = arith.constant 0 : index
    %98 = vector.load %arg2[%c1280, %c0_15] : memref<1664x128xbf16, #tpu.memory_space<vmem>>, vector<128x128xbf16>
    %c3 = arith.constant 3 : index
    %c0_16 = arith.constant 0 : index
    %99 = vector.load %arg3[%c3, %c0_16] : memref<6x128xf32, #tpu.memory_space<vmem>>, vector<1x128xf32>
    %100 = arith.truncf %97 : vector<8x128xf32> to vector<8x128xbf16>
    %cst_17 = arith.constant dense<0.000000e+00> : vector<8x128xf32>
    %101 = tpu.matmul %100, %98, %cst_17 {dimension_numbers = #tpu.dot_dimension_numbers<[1], [0], [0], [1], [0, 0, 1, 1], [], []>} : vector<8x128xbf16>, vector<128x128xbf16>, vector<8x128xf32> -> vector<8x128xf32>
    %102 = vector.broadcast %99 : vector<1x128xf32> to vector<8x128xf32>
    %103 = arith.addf %101, %102 : vector<8x128xf32>
    %104 = arith.addf %103, %89 : vector<8x128xf32>
    %cst_18 = arith.constant 0.000000e+00 : f32
    %105 = vector.broadcast %cst_18 : f32 to vector<8x128xf32>
    %106 = arith.maximumf %104, %105 : vector<8x128xf32>
    %c1408 = arith.constant 1408 : index
    %c0_19 = arith.constant 0 : index
    %107 = vector.load %arg2[%c1408, %c0_19] : memref<1664x128xbf16, #tpu.memory_space<vmem>>, vector<128x128xbf16>
    %c4 = arith.constant 4 : index
    %c0_20 = arith.constant 0 : index
    %108 = vector.load %arg3[%c4, %c0_20] : memref<6x128xf32, #tpu.memory_space<vmem>>, vector<1x128xf32>
    %109 = arith.truncf %106 : vector<8x128xf32> to vector<8x128xbf16>
    %cst_21 = arith.constant dense<0.000000e+00> : vector<8x128xf32>
    %110 = tpu.matmul %109, %107, %cst_21 {dimension_numbers = #tpu.dot_dimension_numbers<[1], [0], [0], [1], [0, 0, 1, 1], [], []>} : vector<8x128xbf16>, vector<128x128xbf16>, vector<8x128xf32> -> vector<8x128xf32>
    %111 = vector.broadcast %108 : vector<1x128xf32> to vector<8x128xf32>
    %112 = arith.addf %110, %111 : vector<8x128xf32>
    %113 = arith.addf %112, %81 : vector<8x128xf32>
    %cst_22 = arith.constant 0.000000e+00 : f32
    %114 = vector.broadcast %cst_22 : f32 to vector<8x128xf32>
    %115 = arith.maximumf %113, %114 : vector<8x128xf32>
    %c1536 = arith.constant 1536 : index
    %c0_23 = arith.constant 0 : index
    %116 = vector.load %arg2[%c1536, %c0_23] : memref<1664x128xbf16, #tpu.memory_space<vmem>>, vector<128x128xbf16>
    %c5 = arith.constant 5 : index
    %c0_24 = arith.constant 0 : index
    %117 = vector.load %arg3[%c5, %c0_24] : memref<6x128xf32, #tpu.memory_space<vmem>>, vector<1x128xf32>
    %118 = arith.truncf %115 : vector<8x128xf32> to vector<8x128xbf16>
    %cst_25 = arith.constant dense<0.000000e+00> : vector<8x128xf32>
    %119 = tpu.matmul %118, %116, %cst_25 {dimension_numbers = #tpu.dot_dimension_numbers<[1], [0], [0], [1], [0, 0, 1, 1], [], []>} : vector<8x128xbf16>, vector<128x128xbf16>, vector<8x128xf32> -> vector<8x128xf32>
    %120 = vector.broadcast %117 : vector<1x128xf32> to vector<8x128xf32>
    %121 = arith.addf %119, %120 : vector<8x128xf32>
    %c0_26 = arith.constant 0 : index
    %c0_27 = arith.constant 0 : index
    %122 = vector.load %arg4[%c0_26, %c0_27] : memref<8x128xf32, #tpu.memory_space<vmem>>, vector<8x128xf32>
    tpu.vector_store %arg4[%c0_26, %c0_27], %121 {strides = array<i32>} : memref<8x128xf32, #tpu.memory_space<vmem>>, vector<8x128xf32>,
    return
  }
  func.func @transform_0(%arg0: i32) -> (i32, i32) {
    %c0_i32 = arith.constant 0 : i32
    %c0_i32_0 = arith.constant 0 : i32
    return %arg0, %c0_i32 : i32, i32
  }
  func.func @transform_1(%arg0: i32) -> (i32, i32) {
    %c0_i32 = arith.constant 0 : i32
    %c0_i32_0 = arith.constant 0 : i32
    %c0_i32_1 = arith.constant 0 : i32
    return %c0_i32, %c0_i32_0 : i32, i32
  }
  func.func @transform_2(%arg0: i32) -> (i32, i32) {
    %c0_i32 = arith.constant 0 : i32
    %c0_i32_0 = arith.constant 0 : i32
    %c0_i32_1 = arith.constant 0 : i32
    return %c0_i32, %c0_i32_0 : i32, i32
  }
  func.func @transform_3(%arg0: i32) -> (i32, i32) {
    %c0_i32 = arith.constant 0 : i32
    %c0_i32_0 = arith.constant 0 : i32
    return %arg0, %c0_i32 : i32, i32
  }
}

</mosaic_0001>

<bundles_post_ra>
// kernel: actor_forward.1
= control target key start
LH: loop header
LB: loop body
LE: loop exit
PB: predicated region body
PF: predicated region fallthrough
CT: control target
= control target key end

     0   :  { %8 = vsyncpa [#allocation3], 0  ;;  %s2187_s12 = smov [#allocation2]   ;;  %s2590_s0 = inlined_call_operand.vmem [shape: s32[8,8], index: 0, kind: input, shape index: {}]   ;;  %s2591_s1 = inlined_call_operand.hbm [shape: bf16[1664,128], index: 1, kind: input, shape index: {}]   ;;  %s2592_s2 = inlined_call_operand.vmem [shape: f32[6,128], index: 2, kind: input, shape index: {}]   ;;  %s2593_s3 = inlined_call_operand.vmem [shape: f32[8,128], index: 3, kind: output, shape index: {}]  }
   0x1   :  { %s16_s13 = sshll.u32 %s2187_s12, 4  ;;  %s2163_s16 = scalar_lea.hbm %s2591_s1, 13312  ;;  %s17_s13 = int_to_ptr.vmem [resolvable:$true] %s16_s13 }
   0x2   :  { %p2164_p0 = scmp.ne.s32.totalorder %s2591_s1, %s2163_s16  ;;  %p2167_p1 = scmp.lt.u32.totalorder %s2163_s16, %s2591_s1 }
   0x4   :  { %p2169_p2 = pnand %p2167_p1, %p2164_p0 }
   0x6   :  { %2172 = shalt.err (!%p2169_p2)
}
   0x7   :  { %s2173_s21 = scalar_lea.vmem %s17_s13, 13312  ;;  %p2178_p4 = scmp.lt.s32.totalorder %s17_s13, %s17_s13 }
   0x8   :  { %p2174_p3 = scmp.ne.s32.totalorder %s17_s13, %s2173_s21  ;;  %p2179_p5 = scmp.lt.s32.totalorder %s2173_s21, %s2173_s21 }
   0xa   :  { %p2180_p6 = por %p2179_p5, %p2178_p4 }
   0xc   :  { %p2181_p7 = pnand %p2180_p6, %p2174_p3 }
   0xe   :  { %2184 = shalt.err (!%p2181_p7)
}
   0xf   :  { %s2188_s22 = smov 64   ;;  %s2189_s23 = smov 4  }
  0x10   :  { %22 = dma.hbm_to_vmem [thread:$0]  %s2591_s1, 13312, %s17_s13, [#allocation3], %s2188_s22, %s2188_s22, %s2189_s23  }
  0x11   :  { %2185 = dma.done.wait [#allocation3], 13312  }
  0x12   :  { %2186 = vsyncadd [#allocation3], 4294953984  ;;  %v2190_v0 = vmov 0   ;;  %v2191_v1 = vmov 2   ;;  %v29_v2 = vld [vmem:[%s2590_s0] sm:$0xff]  ;;  %v2192_v10 = vmov 1   ;;  %v30_v50 = vlaneseq }
  0x13   :  { %2050 = vset.pattern.permute.xlu0 %v2190_v0  ;;  %2052 = vset.pattern.permute.xlu1 %v2191_v1  ;;  %v126_v3 = vadd.s32 256, %v29_v2  ;;  %v2059_v4 = vld [vmem:[#allocation2 + $0x40] sm:$0xff]   ;;  %v82_v6 = vadd.s32 128, %v29_v2  ;;  %v170_v8 = vadd.s32 384, %v29_v2  ;;  %v2063_v11 = vld [vmem:[#allocation2 + $0x48] sm:$0xff]   ;;  %v2193_v13 = vmov 3  }
  0x14   :  { %40 = vperm.xlu0 %2050, %v29_v2   ;;  %v2060_v5 = vld [vmem:[#allocation2 + $0xc0] sm:$0xff]   ;;  %1804 = vmatprep.subr.bf16.mxu0 %v2059_v4  ;;  %v2064_v12 = vld [vmem:[#allocation2 + $0xc8] sm:$0xff]   ;;  %v258_v14 = vadd.s32 640, %v29_v2  ;;  %v214_v17 = vadd.s32 512, %v29_v2  ;;  %v2067_v18 = vld [vmem:[#allocation2 + $0x50] sm:$0xff]   ;;  %v2194_v19 = vmov 5  }
  0x15   :  { %v2061_v7 = vld [vmem:[#allocation2] sm:$0xff]   ;;  %128 = vperm.xlu1 %2052, %v126_v3   ;;  %1826 = vmatprep.subr.bf16.mxu1 %v2060_v5  ;;  %v2065_v15 = vld [vmem:[#allocation2 + $0x8] sm:$0xff]   ;;  %v2068_v20 = vld [vmem:[#allocation2 + $0xd0] sm:$0xff]   ;;  %v2195_v22 = vmov 4   ;;  %v302_v25 = vadd.s32 768, %v29_v2  ;;  %v2196_v28 = vmov 7  }
  0x16   :  { %1805 = vmatpush3.bf16.msra.mxu0 %v2061_v7  ;;  %v2062_v9 = vld [vmem:[#allocation2 + $0x80] sm:$0xff]   ;;  %v2066_v16 = vld [vmem:[#allocation2 + $0x88] sm:$0xff]   ;;  %v2069_v21 = vld [vmem:[#allocation2 + $0x10] sm:$0xff]   ;;  %v2197_v30 = vmov 6   ;;  %v346_v33 = vadd.s32 896, %v29_v2  ;;  %v2235_v51 = vand.u32 127, %v30_v50 }
  0x17   :  { %1827 = vmatpush3.bf16.msra.mxu1 %v2062_v9  ;;  %1806 = vmatprep.subr.bf16.mxu0 %v2063_v11  ;;  %v2070_v23 = vld [vmem:[#allocation2 + $0x90] sm:$0xff]   ;;  %v2071_v24 = vld [vmem:[#allocation2 + $0x58] sm:$0xff]   ;;  %v2075_v31 = vld [vmem:[#allocation2 + $0x60] sm:$0xff]   ;;  %v2198_v57 = vmov 0.0  }
  0x18   :  { %2051 = vset.pattern.permute.xlu0 %v2192_v10  ;;  %1828 = vmatprep.subr.bf16.mxu1 %v2064_v12  ;;  %v2072_v26 = vld [vmem:[#allocation2 + $0xd8] sm:$0xff]   ;;  %v2076_v32 = vld [vmem:[#allocation2 + $0xe0] sm:$0xff]   ;;  %v2079_v36 = vld [vmem:[#allocation2 + $0x68] sm:$0xff]   ;;  %v2238_v52 = vadd.s32 512, %v2235_v51  ;;  %v2241_v53 = vadd.s32 768, %v2235_v51  ;;  %v2244_v54 = vadd.s32 128, %v2235_v51 }
  0x19   :  { %84 = vperm.xlu0 %2051, %v82_v6   ;;  %2053 = vset.pattern.permute.xlu1 %v2193_v13  ;;  %v2073_v27 = vld [vmem:[#allocation2 + $0x18] sm:$0xff]   ;;  %v2077_v34 = vld [vmem:[#allocation2 + $0x20] sm:$0xff]   ;;  %v2080_v37 = vld [vmem:[#allocation2 + $0xe8] sm:$0xff]   ;;  %v2247_v55 = vadd.s32 384, %v2235_v51  ;;  %v2272_v0 = vadd.s32 256, %v2235_v51  ;;  %v2275_v1 = vadd.s32 640, %v2235_v51 }
  0x1a   :  { %172 = vperm.xlu1 %2053, %v170_v8   ;;  %1807 = vmatpush3.bf16.msra.mxu0 %v2065_v15  ;;  %v2074_v29 = vld [vmem:[#allocation2 + $0x98] sm:$0xff]   ;;  %v2078_v35 = vld [vmem:[#allocation2 + $0xa0] sm:$0xff]   ;;  %v2081_v38 = vld [vmem:[#allocation2 + $0x28] sm:$0xff]   ;;  %v2278_v2 = vadd.s32 896, %v2235_v51 }
  0x1b   :  { %1829 = vmatpush3.bf16.msra.mxu1 %v2066_v16  ;;  %1808 = vmatprep.subr.bf16.mxu0 %v2067_v18  ;;  %v2082_v39 = vld [vmem:[#allocation2 + $0xa8] sm:$0xff]   ;;  %v2083_v40 = vld [vmem:[#allocation2 + $0x70] sm:$0xff]   ;;  %v2087_v44 = vld [vmem:[#allocation2 + $0x78] sm:$0xff]  }
  0x1c   :  { %1830 = vmatprep.subr.bf16.mxu1 %v2068_v20  ;;  %v2084_v41 = vld [vmem:[#allocation2 + $0xf0] sm:$0xff]   ;;  %v2088_v45 = vld [vmem:[#allocation2 + $0xf8] sm:$0xff]   ;;  %v2091_v48 = vld [vmem:[#allocation2 + $0x140] sm:$0xff]  }
  0x1d   :  { %2055 = vset.pattern.permute.xlu0 %v2194_v19  ;;  %v2085_v42 = vld [vmem:[#allocation2 + $0x30] sm:$0xff]   ;;  %v2089_v46 = vld [vmem:[#allocation2 + $0x38] sm:$0xff]   ;;  %v2092_v49 = vld [vmem:[#allocation2 + $0x1c0] sm:$0xff]  }
  0x1e   :  { %260 = vperm.xlu0 %2055, %v258_v14   ;;  %2054 = vset.pattern.permute.xlu1 %v2195_v22  ;;  %v2086_v43 = vld [vmem:[#allocation2 + $0xb0] sm:$0xff]   ;;  %v2090_v47 = vld [vmem:[#allocation2 + $0xb8] sm:$0xff]  }
  0x1f   :  { %216 = vperm.xlu1 %2054, %v214_v17   ;;  %1809 = vmatpush3.bf16.msra.mxu0 %v2069_v21 }
  0x20   :  { %1831 = vmatpush3.bf16.msra.mxu1 %v2070_v23  ;;  %1810 = vmatprep.subr.bf16.mxu0 %v2071_v24 }
  0x21   :  { %1832 = vmatprep.subr.bf16.mxu1 %v2072_v26 }
  0x22   :  { %2058 = vset.pattern.permute.xlu0 %v2196_v28 }
  0x23   :  { %2056 = vset.pattern.permute.xlu1 %v2197_v30  ;;  %1811 = vmatpush3.bf16.msra.mxu0 %v2073_v27 }
  0x24   :  { %304 = vperm.xlu1 %2056, %v302_v25   ;;  %1833 = vmatpush3.bf16.msra.mxu1 %v2074_v29 }
  0x25   :  { %1812 = vmatprep.subr.bf16.mxu0 %v2075_v31  ;;  %1834 = vmatprep.subr.bf16.mxu1 %v2076_v32 }
  0x27   :  { %1813 = vmatpush3.bf16.msra.mxu0 %v2077_v34 }
  0x28   :  { %2057 = vset.pattern.permute.xlu1 %v2196_v28  ;;  %1835 = vmatpush3.bf16.msra.mxu1 %v2078_v35 }
  0x29   :  { %348 = vperm.xlu1 %2057, %v346_v33   ;;  %1814 = vmatprep.subr.bf16.mxu0 %v2079_v36 }
  0x2a   :  { %1836 = vmatprep.subr.bf16.mxu1 %v2080_v37 }
  0x2b   :  { %1815 = vmatpush3.bf16.msra.mxu0 %v2081_v38 }
  0x2c   :  { %1837 = vmatpush3.bf16.msra.mxu1 %v2082_v39  ;;  %1816 = vmatprep.subr.bf16.mxu0 %v2083_v40 }
  0x2d   :  { %1838 = vmatprep.subr.bf16.mxu1 %v2084_v41 }
  0x2f   :  { %1817 = vmatpush3.bf16.msra.mxu0 %v2085_v42 }
  0x30   :  { %1839 = vmatpush3.bf16.msra.mxu1 %v2086_v43  ;;  %1818 = vmatprep.subr.bf16.mxu0 %v2087_v44 }
  0x31   :  { %1840 = vmatprep.subr.bf16.mxu1 %v2088_v45 }
  0x33   :  { %1819 = vmatpush3.bf16.msra.mxu0 %v2089_v46 }
  0x34   :  { %1841 = vmatpush3.bf16.msra.mxu1 %v2090_v47  ;;  %1848 = vmatprep.subr.bf16.mxu0 %v2091_v48 }
  0x35   :  { %1870 = vmatprep.subr.bf16.mxu1 %v2092_v49 }
  0x93   :  { %v2249_v56 = vpop.permute.xlu0 %40 }
  0x94   :  { %vm46_vm0 = vcmp.eq.s32.totalorder %v2238_v52, %v2249_v56  ;;  %vm48_vm1 = vcmp.eq.s32.totalorder %v2241_v53, %v2249_v56  ;;  %vm43_vm2 = vcmp.eq.s32.totalorder %v2244_v54, %v2249_v56  ;;  %vm45_vm3 = vcmp.eq.s32.totalorder %v2247_v55, %v2249_v56  ;;  %v2265_v60 = vpop.permute.xlu1 %128 }
  0x95   :  { %v2260_v58 = vsel %vm46_vm0, 1.0, %v2198_v57  ;;  %v2263_v59 = vsel %vm48_vm1, 1.0, %v2198_v57  ;;  %v1631_v61 = vsel %vm43_vm2, 1.0, %v2198_v57  ;;  %v1633_v62 = vsel %vm45_vm3, 1.0, %v2198_v57 }
  0x96   :  { %v70_v63 = vpack.c.bf16 %v2260_v58, %v2260_v58  ;;  %v72_v3 = vpack.c.bf16 %v2263_v59, %v2263_v59  ;;  %v67_v4 = vpack.c.bf16 %v1631_v61, %v1631_v61  ;;  %vm131_vm4 = vcmp.eq.s32.totalorder %v2244_v54, %v2265_v60 }
  0x97   :  { %vm133_vm5 = vcmp.eq.s32.totalorder %v2247_v55, %v2265_v60  ;;  %v1647_v6 = vsel %vm131_vm4, 1.0, %v2198_v57  ;;  %v69_v7 = vpack.c.bf16 %v1633_v62, %v1633_v62  ;;  %vm42_vm6 = vcmp.eq.s32.totalorder %v2235_v51, %v2249_v56 }
  0x98   :  { %v2286_v5 = vpop.permute.xlu0 %84  ;;  %v1649_v8 = vsel %vm133_vm5, 1.0, %v2198_v57  ;;  %v75_v9 = vadd.bf16 0, %v67_v4  ;;  %vm130_vm10 = vcmp.eq.s32.totalorder %v2235_v51, %v2265_v60  ;;  %v155_v16 = vpack.c.bf16 %v1647_v6, %v1647_v6 }
  0x99   :  { %vm90_vm7 = vcmp.eq.s32.totalorder %v2238_v52, %v2286_v5  ;;  %vm92_vm8 = vcmp.eq.s32.totalorder %v2241_v53, %v2286_v5  ;;  %vm87_vm9 = vcmp.eq.s32.totalorder %v2244_v54, %v2286_v5  ;;  %v2304_v12 = vpop.permute.xlu1 %172  ;;  %v77_v18 = vadd.bf16 0, %v69_v7 }
  0x9a   :  { %v2299_v10 = vsel %vm90_vm7, 1.0, %v2198_v57  ;;  %v2302_v11 = vsel %vm92_vm8, 1.0, %v2198_v57  ;;  %v1639_v13 = vsel %vm87_vm9, 1.0, %v2198_v57  ;;  %vm175_vm11 = vcmp.eq.s32.totalorder %v2244_v54, %v2304_v12 }
  0x9b   :  { %v114_v14 = vpack.c.bf16 %v2299_v10, %v2299_v10  ;;  %v111_v15 = vpack.c.bf16 %v1639_v13, %v1639_v13  ;;  %v1655_v17 = vsel %vm175_vm11, 1.0, %v2198_v57  ;;  %vm89_vm12 = vcmp.eq.s32.totalorder %v2247_v55, %v2286_v5  ;;  %v2104_v10 = vld [vmem:[#allocation2 + $0x1d8] sm:$0xff]  }
  0x9c   :  { %v157_v19 = vpack.c.bf16 %v1649_v8, %v1649_v8  ;;  %v199_v22 = vpack.c.bf16 %v1655_v17, %v1655_v17  ;;  %v1641_v23 = vsel %vm89_vm12, 1.0, %v2198_v57  ;;  %vm177_vm13 = vcmp.eq.s32.totalorder %v2247_v55, %v2304_v12 }
  0x9d   :  { %v2316_v20 = vpop.permute.xlu0 %260  ;;  %v119_v21 = vadd.bf16 %v111_v15, %v75_v9  ;;  %v113_v24 = vpack.c.bf16 %v1641_v23, %v1641_v23  ;;  %v1657_v25 = vsel %vm177_vm13, 1.0, %v2198_v57  ;;  %v1630_v40 = vsel %vm42_vm6, 1.0, %v2198_v57 }
  0x9e   :  { %vm263_vm14 = vcmp.eq.s32.totalorder %v2244_v54, %v2316_v20  ;;  %vm265_vm15 = vcmp.eq.s32.totalorder %v2247_v55, %v2316_v20  ;;  %v2326_v26 = vpop.permute.xlu1 %216  ;;  %v201_v29 = vpack.c.bf16 %v1657_v25, %v1657_v25  ;;  %v66_v41 = vpack.c.bf16 %v1630_v40, %v1630_v40 }
  0x9f   :  { %v163_v27 = vadd.bf16 %v155_v16, %v119_v21  ;;  %v1671_v28 = vsel %vm263_vm14, 1.0, %v2198_v57  ;;  %v1673_v30 = vsel %vm265_vm15, 1.0, %v2198_v57  ;;  %vm219_vm0 = vcmp.eq.s32.totalorder %v2244_v54, %v2326_v26 }
  0xa0   :  { %v287_v31 = vpack.c.bf16 %v1671_v28, %v1671_v28  ;;  %v121_v32 = vadd.bf16 %v113_v24, %v77_v18  ;;  %vm221_vm1 = vcmp.eq.s32.totalorder %v2247_v55, %v2326_v26  ;;  %v1663_v34 = vsel %vm219_vm0, 1.0, %v2198_v57 }
  0xa1   :  { %v207_v33 = vadd.bf16 %v199_v22, %v163_v27  ;;  %v1665_v35 = vsel %vm221_vm1, 1.0, %v2198_v57  ;;  %v289_v36 = vpack.c.bf16 %v1673_v30, %v1673_v30  ;;  %v243_v37 = vpack.c.bf16 %v1663_v34, %v1663_v34 }
  0xa2   :  { %v165_v38 = vadd.bf16 %v157_v19, %v121_v32  ;;  %v245_v39 = vpack.c.bf16 %v1665_v35, %v1665_v35  ;;  %vm86_vm2 = vcmp.eq.s32.totalorder %v2235_v51, %v2286_v5  ;;  %v1646_v42 = vsel %vm130_vm10, 1.0, %v2198_v57 }
  0xa3   :  { %vm174_vm3 = vcmp.eq.s32.totalorder %v2235_v51, %v2304_v12  ;;  %v2348_v43 = vpop.permute.xlu1 %304  ;;  %v251_v44 = vadd.bf16 %v243_v37, %v207_v33  ;;  %v1638_v46 = vsel %vm86_vm2, 1.0, %v2198_v57  ;;  %v154_v47 = vpack.c.bf16 %v1646_v42, %v1646_v42 }
  0xa4   :  { %v209_v45 = vadd.bf16 %v201_v29, %v165_v38  ;;  %vm307_vm4 = vcmp.eq.s32.totalorder %v2244_v54, %v2348_v43  ;;  %vm309_vm5 = vcmp.eq.s32.totalorder %v2247_v55, %v2348_v43  ;;  %v74_v48 = vadd.bf16 0, %v66_v41 }
  0xa5   :  { %v110_v49 = vpack.c.bf16 %v1638_v46, %v1638_v46  ;;  %v295_v50 = vadd.bf16 %v287_v31, %v251_v44  ;;  %v1679_v61 = vsel %vm307_vm4, 1.0, %v2198_v57  ;;  %v1681_v4 = vsel %vm309_vm5, 1.0, %v2198_v57 }
  0xa6   :  { %v253_v62 = vadd.bf16 %v245_v39, %v209_v45  ;;  %v331_v6 = vpack.c.bf16 %v1679_v61, %v1679_v61  ;;  %v333_v7 = vpack.c.bf16 %v1681_v4, %v1681_v4  ;;  %v1654_v9 = vsel %vm174_vm3, 1.0, %v2198_v57  ;;  %v2095_v61 = vld [vmem:[#allocation2 + $0x148] sm:$0xff]  }
  0xa7   :  { %v118_v8 = vadd.bf16 %v110_v49, %v74_v48  ;;  %v198_v15 = vpack.c.bf16 %v1654_v9, %v1654_v9  ;;  %vm218_vm6 = vcmp.eq.s32.totalorder %v2235_v51, %v2326_v26  ;;  %vm262_vm7 = vcmp.eq.s32.totalorder %v2235_v51, %v2316_v20 }
  0xa8   :  { %v297_v13 = vadd.bf16 %v289_v36, %v253_v62  ;;  %v2365_v16 = vpop.permute.xlu1 %348  ;;  %v339_v17 = vadd.bf16 %v331_v6, %v295_v50  ;;  %v1662_v19 = vsel %vm218_vm6, 1.0, %v2198_v57  ;;  %v1670_v21 = vsel %vm262_vm7, 1.0, %v2198_v57 }
  0xa9   :  { %v162_v18 = vadd.bf16 %v154_v47, %v118_v8  ;;  %vm351_vm8 = vcmp.eq.s32.totalorder %v2244_v54, %v2365_v16  ;;  %vm353_vm9 = vcmp.eq.s32.totalorder %v2247_v55, %v2365_v16  ;;  %v242_v23 = vpack.c.bf16 %v1662_v19, %v1662_v19  ;;  %v2093_v47 = vld [vmem:[#allocation2 + $0x100] sm:$0xff]  }
  0xaa   :  { %v341_v22 = vadd.bf16 %v333_v7, %v297_v13  ;;  %v1687_v24 = vsel %vm351_vm8, 1.0, %v2198_v57  ;;  %v1689_v25 = vsel %vm353_vm9, 1.0, %v2198_v57  ;;  %v286_v28 = vpack.c.bf16 %v1670_v21, %v1670_v21 }
  0xab   :  { %v206_v27 = vadd.bf16 %v198_v15, %v162_v18  ;;  %v375_v29 = vpack.c.bf16 %v1687_v24, %v1687_v24  ;;  %v377_v30 = vpack.c.bf16 %v1689_v25, %v1689_v25  ;;  %vm306_vm10 = vcmp.eq.s32.totalorder %v2235_v51, %v2348_v43  ;;  %v2097_v18 = vld [vmem:[#allocation2 + $0x108] sm:$0xff]  }
  0xac   :  { %vm350_vm11 = vcmp.eq.s32.totalorder %v2235_v51, %v2365_v16  ;;  %v1678_v31 = vsel %vm306_vm10, 1.0, %v2198_v57  ;;  %vm44_vm12 = vcmp.eq.s32.totalorder %v2272_v0, %v2249_v56  ;;  %vm88_vm13 = vcmp.eq.s32.totalorder %v2272_v0, %v2286_v5 }
  0xad   :  { %v250_v54 = vadd.bf16 %v242_v23, %v206_v27  ;;  %v1686_v55 = vsel %vm350_vm11, 1.0, %v2198_v57  ;;  %v383_v32 = vadd.bf16 %v375_v29, %v339_v17  ;;  %v385_v33 = vadd.bf16 %v377_v30, %v341_v22 }
  0xae   :  { %v330_v34 = vpack.c.bf16 %v1678_v31, %v1678_v31  ;;  %v374_v35 = vpack.c.bf16 %v1686_v55, %v1686_v55  ;;  %v1632_v37 = vsel %vm44_vm12, 1.0, %v2198_v57  ;;  %vm132_vm14 = vcmp.eq.s32.totalorder %v2272_v0, %v2265_v60  ;;  %v2101_v55 = vld [vmem:[#allocation2 + $0x110] sm:$0xff]  }
  0xaf   :  { %v294_v36 = vadd.bf16 %v286_v28, %v250_v54  ;;  %939 = vmatprep.mubr.bf16.mxu0 %v383_v32  ;;  %979 = vmatprep.mubr.bf16.mxu1 %v385_v33  ;;  %v68_v51 = vpack.c.bf16 %v1632_v37, %v1632_v37  ;;  %v1640_v38 = vsel %vm88_vm13, 1.0, %v2198_v57  ;;  %v1648_v39 = vsel %vm132_vm14, 1.0, %v2198_v57 }
  0xb0   :  { %vm176_vm15 = vcmp.eq.s32.totalorder %v2272_v0, %v2304_v12  ;;  %v116_v40 = vpack.c.bf16 %v2302_v11, %v2302_v11  ;;  %v112_v42 = vpack.c.bf16 %v1640_v38, %v1640_v38  ;;  %v156_v46 = vpack.c.bf16 %v1648_v39, %v1648_v39 }
  0xb1   :  { %v338_v41 = vadd.bf16 %v330_v34, %v294_v36  ;;  %v1656_v44 = vsel %vm176_vm15, 1.0, %v2198_v57  ;;  %v76_v45 = vadd.bf16 0, %v68_v51  ;;  %vm220_vm0 = vcmp.eq.s32.totalorder %v2272_v0, %v2326_v26  ;;  %v2103_v34 = vld [vmem:[#allocation2 + $0x158] sm:$0xff]  }
  0xb2   :  { %vm264_vm1 = vcmp.eq.s32.totalorder %v2272_v0, %v2316_v20  ;;  %v1664_v49 = vsel %vm220_vm0, 1.0, %v2198_v57  ;;  %vm308_vm2 = vcmp.eq.s32.totalorder %v2272_v0, %v2348_v43  ;;  %v200_v4 = vpack.c.bf16 %v1656_v44, %v1656_v44 }
  0xb3   :  { %v382_v48 = vadd.bf16 %v374_v35, %v338_v41  ;;  %v1672_v50 = vsel %vm264_vm1, 1.0, %v2198_v57  ;;  %v120_v62 = vadd.bf16 %v112_v42, %v76_v45  ;;  %v244_v6 = vpack.c.bf16 %v1664_v49, %v1664_v49  ;;  %v2094_v45 = vld [vmem:[#allocation2 + $0x180] sm:$0xff]  }
  0xb4   :  { %v1680_v7 = vsel %vm308_vm2, 1.0, %v2198_v57  ;;  %v288_v8 = vpack.c.bf16 %v1672_v50, %v1672_v50  ;;  %vm352_vm3 = vcmp.eq.s32.totalorder %v2272_v0, %v2365_v16  ;;  %vm47_vm4 = vcmp.eq.s32.totalorder %v2275_v1, %v2249_v56  ;;  %v2099_v0 = vld [vmem:[#allocation2 + $0x150] sm:$0xff]  }
  0xb5   :  { %940 = vmatmul.mubr.bf16.vlgmr.msra.gmra.mrb[0].mxu0 %v382_v48  ;;  %vm91_vm5 = vcmp.eq.s32.totalorder %v2275_v1, %v2286_v5  ;;  %v164_v9 = vadd.bf16 %v156_v46, %v120_v62  ;;  %v1688_v13 = vsel %vm352_vm3, 1.0, %v2198_v57  ;;  %v1635_v15 = vsel %vm47_vm4, 1.0, %v2198_v57 }
  0xb6   :  { %1849 = vmatpush3.bf16.msra.mxu0 %v2093_v47  ;;  %v1643_v17 = vsel %vm91_vm5, 1.0, %v2198_v57  ;;  %v332_v19 = vpack.c.bf16 %v1680_v7, %v1680_v7  ;;  %v71_v21 = vpack.c.bf16 %v1635_v15, %v1635_v15  ;;  %vm135_vm6 = vcmp.eq.s32.totalorder %v2275_v1, %v2265_v60 }
  0xb7   :  { %v115_v22 = vpack.c.bf16 %v1643_v17, %v1643_v17  ;;  %1850 = vmatprep.subr.bf16.mxu0 %v2095_v61  ;;  %v208_v23 = vadd.bf16 %v200_v4, %v164_v9  ;;  %v1651_v24 = vsel %vm135_vm6, 1.0, %v2198_v57  ;;  %vm179_vm7 = vcmp.eq.s32.totalorder %v2275_v1, %v2304_v12 }
  0xb8   :  { %vm223_vm8 = vcmp.eq.s32.totalorder %v2275_v1, %v2326_v26  ;;  %v376_v25 = vpack.c.bf16 %v1688_v13, %v1688_v13  ;;  %v79_v27 = vadd.bf16 0, %v71_v21  ;;  %v1659_v28 = vsel %vm179_vm7, 1.0, %v2198_v57  ;;  %v2109_v13 = vld [vmem:[#allocation2 + $0x120] sm:$0xff]   ;;  %v2098_v21 = vld [vmem:[#allocation2 + $0x188] sm:$0xff]  }
  0xb9   :  { %v1667_v29 = vsel %vm223_vm8, 1.0, %v2198_v57  ;;  %v252_v30 = vadd.bf16 %v244_v6, %v208_v23  ;;  %v159_v54 = vpack.c.bf16 %v1651_v24, %v1651_v24  ;;  %v203_v31 = vpack.c.bf16 %v1659_v28, %v1659_v28  ;;  %v2100_v24 = vld [vmem:[#allocation2 + $0x1d0] sm:$0xff]  }
  0xba   :  { %vm267_vm9 = vcmp.eq.s32.totalorder %v2275_v1, %v2316_v20  ;;  %1851 = vmatpush3.bf16.msra.mxu0 %v2097_v18  ;;  %vm134_vm10 = vcmp.eq.s32.totalorder %v2238_v52, %v2265_v60  ;;  %v123_v32 = vadd.bf16 %v115_v22, %v79_v27  ;;  %vm311_vm11 = vcmp.eq.s32.totalorder %v2275_v1, %v2348_v43  ;;  %v2111_v22 = vld [vmem:[#allocation2 + $0x168] sm:$0xff]  }
  0xbb   :  { %v1675_v33 = vsel %vm267_vm9, 1.0, %v2198_v57  ;;  %vm355_vm12 = vcmp.eq.s32.totalorder %v2275_v1, %v2365_v16  ;;  %1852 = vmatprep.subr.bf16.mxu0 %v2099_v0  ;;  %v296_v35 = vadd.bf16 %v288_v8, %v252_v30  ;;  %v247_v36 = vpack.c.bf16 %v1667_v29, %v1667_v29  ;;  %v2105_v1 = vld [vmem:[#allocation2 + $0x118] sm:$0xff]  }
  0xbc   :  { %v291_v37 = vpack.c.bf16 %v1675_v33, %v1675_v33  ;;  %v1683_v51 = vsel %vm311_vm11, 1.0, %v2198_v57  ;;  %v167_v38 = vadd.bf16 %v159_v54, %v123_v32  ;;  %v1691_v41 = vsel %vm355_vm12, 1.0, %v2198_v57  ;;  %v2102_v32 = vld [vmem:[#allocation2 + $0x190] sm:$0xff]  }
  0xbd   :  { %v335_v39 = vpack.c.bf16 %v1683_v51, %v1683_v51  ;;  %vm49_vm13 = vcmp.eq.s32.totalorder %v2278_v2, %v2249_v56  ;;  %v340_v42 = vadd.bf16 %v332_v19, %v296_v35  ;;  %vm93_vm14 = vcmp.eq.s32.totalorder %v2278_v2, %v2286_v5  ;;  %v2107_v56 = vld [vmem:[#allocation2 + $0x160] sm:$0xff]   ;;  %v2096_v5 = vld [vmem:[#allocation2 + $0x1c8] sm:$0xff]   ;;  %v2115_v33 = vld [vmem:[#allocation2 + $0x170] sm:$0xff]  }
  0xbe   :  { %v1637_v44 = vsel %vm49_vm13, 1.0, %v2198_v57  ;;  %vm137_vm15 = vcmp.eq.s32.totalorder %v2278_v2, %v2265_v60  ;;  %1853 = vmatpush3.bf16.msra.mxu0 %v2101_v55  ;;  %v211_v46 = vadd.bf16 %v203_v31, %v167_v38  ;;  %v1645_v48 = vsel %vm93_vm14, 1.0, %v2198_v57  ;;  %v2113_v31 = vld [vmem:[#allocation2 + $0x128] sm:$0xff]  }
  0xbf   :  { %v73_v47 = vpack.c.bf16 %v1637_v44, %v1637_v44  ;;  %v1653_v49 = vsel %vm137_vm15, 1.0, %v2198_v57  ;;  %1854 = vmatprep.subr.bf16.mxu0 %v2103_v34  ;;  %v384_v50 = vadd.bf16 %v376_v25, %v340_v42  ;;  %v379_v61 = vpack.c.bf16 %v1691_v41, %v1691_v41  ;;  %v2117_v41 = vld [vmem:[#allocation2 + $0x130] sm:$0xff]  }
  0xc0   :  { %v117_v62 = vpack.c.bf16 %v1645_v48, %v1645_v48  ;;  %vm181_vm0 = vcmp.eq.s32.totalorder %v2278_v2, %v2304_v12  ;;  %vm136_vm1 = vcmp.eq.s32.totalorder %v2241_v53, %v2265_v60  ;;  %v255_v4 = vadd.bf16 %v247_v36, %v211_v46  ;;  %v2119_v46 = vld [vmem:[#allocation2 + $0x178] sm:$0xff]  }
  0xc1   :  { %v81_v6 = vadd.bf16 0, %v73_v47  ;;  %v1661_v7 = vsel %vm181_vm0, 1.0, %v2198_v57  ;;  %vm225_vm2 = vcmp.eq.s32.totalorder %v2278_v2, %v2326_v26  ;;  %980 = vmatmul.mubr.bf16.vlgmr.msra.gmra.mrb[0].mxu1 %v384_v50  ;;  %v161_v8 = vpack.c.bf16 %v1653_v49, %v1653_v49  ;;  %v2108_v49 = vld [vmem:[#allocation2 + $0x1e0] sm:$0xff]  }
  0xc2   :  { %v1669_v9 = vsel %vm225_vm2, 1.0, %v2198_v57  ;;  %vm269_vm3 = vcmp.eq.s32.totalorder %v2278_v2, %v2316_v20  ;;  %vm313_vm4 = vcmp.eq.s32.totalorder %v2278_v2, %v2348_v43  ;;  %1855 = vmatpush3.bf16.msra.mxu0 %v2105_v1  ;;  %1871 = vmatpush3.bf16.msra.mxu1 %v2094_v45  ;;  %v299_v15 = vadd.bf16 %v291_v37, %v255_v4  ;;  %v2106_v45 = vld [vmem:[#allocation2 + $0x198] sm:$0xff]  }
  0xc3   :  { %v125_v17 = vadd.bf16 %v117_v62, %v81_v6  ;;  %v205_v18 = vpack.c.bf16 %v1661_v7, %v1661_v7  ;;  %v1677_v19 = vsel %vm269_vm3, 1.0, %v2198_v57  ;;  %1856 = vmatprep.subr.bf16.mxu0 %v2107_v56  ;;  %v249_v0 = vpack.c.bf16 %v1669_v9, %v1669_v9  ;;  %1872 = vmatprep.subr.bf16.mxu1 %v2096_v5  ;;  %v2121_v6 = vld [vmem:[#allocation2 + $0x138] sm:$0xff]   ;;  %v2110_v7 = vld [vmem:[#allocation2 + $0x1a0] sm:$0xff]  }
  0xc4   :  { %v1685_v23 = vsel %vm313_vm4, 1.0, %v2198_v57  ;;  %vm357_vm5 = vcmp.eq.s32.totalorder %v2278_v2, %v2365_v16  ;;  %v78_v25 = vadd.bf16 0, %v70_v63  ;;  %v343_v27 = vadd.bf16 %v335_v39, %v299_v15 }
  0xc5   :  { %v169_v28 = vadd.bf16 %v161_v8, %v125_v17  ;;  %v293_v29 = vpack.c.bf16 %v1677_v19, %v1677_v19  ;;  %v337_v30 = vpack.c.bf16 %v1685_v23, %v1685_v23  ;;  %v1693_v54 = vsel %vm357_vm5, 1.0, %v2198_v57  ;;  %v2118_v23 = vld [vmem:[#allocation2 + $0x1b0] sm:$0xff]  }
  0xc6   :  { %1857 = vmatpush3.bf16.msra.mxu0 %v2109_v13  ;;  %v122_v55 = vadd.bf16 %v114_v14, %v78_v25  ;;  %v1650_v2 = vsel %vm134_vm10, 1.0, %v2198_v57  ;;  %vm178_vm6 = vcmp.eq.s32.totalorder %v2238_v52, %v2304_v12  ;;  %v387_v58 = vadd.bf16 %v379_v61, %v343_v27  ;;  %1873 = vmatpush3.bf16.msra.mxu1 %v2098_v21  ;;  %v2112_v13 = vld [vmem:[#allocation2 + $0x1e8] sm:$0xff]   ;;  %v2120_v25 = vld [vmem:[#allocation2 + $0x1f8] sm:$0xff]  }
  0xc7   :  { %v213_v63 = vadd.bf16 %v205_v18, %v169_v28  ;;  %1858 = vmatprep.subr.bf16.mxu0 %v2111_v22  ;;  %v158_v34 = vpack.c.bf16 %v1650_v2, %v1650_v2  ;;  %v1658_v35 = vsel %vm178_vm6, 1.0, %v2198_v57  ;;  %1874 = vmatprep.subr.bf16.mxu1 %v2100_v24  ;;  %vm222_vm7 = vcmp.eq.s32.totalorder %v2238_v52, %v2326_v26  ;;  %v2114_v18 = vld [vmem:[#allocation2 + $0x1a8] sm:$0xff]   ;;  %v2116_v22 = vld [vmem:[#allocation2 + $0x1f0] sm:$0xff]   ;;  %v2126_v2 = vld [vmem:[#allocation2 + $0x218] sm:$0xff]  }
  0xc8   :  { %v202_v14 = vpack.c.bf16 %v1658_v35, %v1658_v35  ;;  %vm266_vm8 = vcmp.eq.s32.totalorder %v2238_v52, %v2316_v20  ;;  %vm310_vm9 = vcmp.eq.s32.totalorder %v2238_v52, %v2348_v43  ;;  %1019 = vmatprep.mubr.bf16.mxu0 %v387_v58  ;;  %v1666_v51 = vsel %vm222_vm7, 1.0, %v2198_v57  ;;  %v2127_v58 = vld [vmem:[#allocation2 + $0x220] sm:$0xff]   ;;  %v2130_v35 = vld [vmem:[#allocation2 + $0x238] sm:$0xff]  }
  0xc9   :  { %v257_v36 = vadd.bf16 %v249_v0, %v213_v63  ;;  %v166_v37 = vadd.bf16 %v158_v34, %v122_v55  ;;  %v1674_v38 = vsel %vm266_vm8, 1.0, %v2198_v57  ;;  %v381_v39 = vpack.c.bf16 %v1693_v54, %v1693_v54  ;;  %v2125_v55 = vld [vmem:[#allocation2 + $0x210] sm:$0xff]   ;;  %v2128_v63 = vld [vmem:[#allocation2 + $0x228] sm:$0xff]  }
  0xca   :  { %1859 = vmatpush3.bf16.msra.mxu0 %v2113_v31  ;;  %v246_v42 = vpack.c.bf16 %v1666_v51, %v1666_v51  ;;  %v1682_v44 = vsel %vm310_vm9, 1.0, %v2198_v57  ;;  %vm354_vm10 = vcmp.eq.s32.totalorder %v2238_v52, %v2365_v16  ;;  %1875 = vmatpush3.bf16.msra.mxu1 %v2102_v32  ;;  %v290_v48 = vpack.c.bf16 %v1674_v38, %v1674_v38  ;;  %v2129_v32 = vld [vmem:[#allocation2 + $0x230] sm:$0xff]   ;;  %v2132_v34 = vld [vmem:[#allocation2 + $0x248] sm:$0xff]  }
  0xcb   :  { %v301_v1 = vadd.bf16 %v293_v29, %v257_v36  ;;  %1860 = vmatprep.subr.bf16.mxu0 %v2115_v33  ;;  %v210_v47 = vadd.bf16 %v202_v14, %v166_v37  ;;  %1876 = vmatprep.subr.bf16.mxu1 %v2104_v10  ;;  %v1690_v56 = vsel %vm354_vm10, 1.0, %v2198_v57  ;;  %v80_v50 = vadd.bf16 0, %v72_v3  ;;  %v2131_v33 = vld [vmem:[#allocation2 + $0x240] sm:$0xff]   ;;  %v2133_v10 = vld [vmem:[#allocation2 + $0x250] sm:$0xff]   ;;  %v2134_v14 = vld [vmem:[#allocation2 + $0x258] sm:$0xff]  }
  0xcc   :  { %v1652_v52 = vsel %vm136_vm1, 1.0, %v2198_v57  ;;  %vm180_vm11 = vcmp.eq.s32.totalorder %v2241_v53, %v2304_v12  ;;  %v334_v5 = vpack.c.bf16 %v1682_v44, %v1682_v44  ;;  %vm224_vm12 = vcmp.eq.s32.totalorder %v2241_v53, %v2326_v26  ;;  %v2135_v36 = vld [vmem:[#allocation2 + $0x260] sm:$0xff]   ;;  %v2136_v37 = vld [vmem:[#allocation2 + $0x268] sm:$0xff]  }
  0xcd   :  { %v345_v61 = vadd.bf16 %v337_v30, %v301_v1  ;;  %v254_v62 = vadd.bf16 %v246_v42, %v210_v47  ;;  %v1660_v4 = vsel %vm180_vm11, 1.0, %v2198_v57  ;;  %v124_v59 = vadd.bf16 %v116_v40, %v80_v50  ;;  %v2122_v30 = vld [vmem:[#allocation2 + $0x1b8] sm:$0xff]   ;;  %v1694_v44 = vld [vmem:[%s2592_s2] ss:$0 sm:$0xff] }
  0xce   :  { %1861 = vmatpush3.bf16.msra.mxu0 %v2117_v41  ;;  %v160_v3 = vpack.c.bf16 %v1652_v52, %v1652_v52  ;;  %1877 = vmatpush3.bf16.msra.mxu1 %v2106_v45  ;;  %v378_v8 = vpack.c.bf16 %v1690_v56, %v1690_v56  ;;  %v1668_v9 = vsel %vm224_vm12, 1.0, %v2198_v57  ;;  %v204_v17 = vpack.c.bf16 %v1660_v4, %v1660_v4 }
  0xcf   :  { %v389_v60 = vadd.bf16 %v381_v39, %v345_v61  ;;  %1862 = vmatprep.subr.bf16.mxu0 %v2119_v46  ;;  %v298_v12 = vadd.bf16 %v290_v48, %v254_v62  ;;  %1878 = vmatprep.subr.bf16.mxu1 %v2108_v49  ;;  %vm268_vm13 = vcmp.eq.s32.totalorder %v2241_v53, %v2316_v20  ;;  %vm2199_vm0 = vmmov 0  }
  0xd0   :  { %v168_v15 = vadd.bf16 %v160_v3, %v124_v59  ;;  %v248_v26 = vpack.c.bf16 %v1668_v9, %v1668_v9  ;;  %v1676_v21 = vsel %vm268_vm13, 1.0, %v2198_v57  ;;  %vm312_vm14 = vcmp.eq.s32.totalorder %v2241_v53, %v2348_v43 }
  0xd1   :  { %1059 = vmatprep.mubr.bf16.mxu1 %v389_v60  ;;  %v342_v11 = vadd.bf16 %v334_v5, %v298_v12  ;;  %v292_v20 = vpack.c.bf16 %v1676_v21, %v1676_v21  ;;  %vm356_vm15 = vcmp.eq.s32.totalorder %v2241_v53, %v2365_v16  ;;  %v1684_v24 = vsel %vm312_vm14, 1.0, %v2198_v57  ;;  %v2123_v53 = vld [vmem:[#allocation2 + $0x200] sm:$0xff]   ;;  %v2124_v16 = vld [vmem:[#allocation2 + $0x208] sm:$0xff]  }
  0xd2   :  { %1863 = vmatpush3.bf16.msra.mxu0 %v2121_v6  ;;  %v212_v40 = vadd.bf16 %v204_v17, %v168_v15  ;;  %1879 = vmatpush3.bf16.msra.mxu1 %v2110_v7  ;;  %v1692_v27 = vsel %vm356_vm15, 1.0, %v2198_v57  ;;  %v336_v29 = vpack.c.bf16 %v1684_v24, %v1684_v24  ;;  %v2138_v15 = vld [vmem:[#allocation2 + $0x278] sm:$0xff]   ;;  %v2139_v17 = vld [vmem:[#allocation2 + $0x280] sm:$0xff]  }
  0xd3   :  { %v386_v19 = vadd.bf16 %v378_v8, %v342_v11  ;;  %1937 = vmatprep.subr.bf16.mxu0 %v2198_v57  ;;  %1880 = vmatprep.subr.bf16.mxu1 %v2112_v13  ;;  %v380_v43 = vpack.c.bf16 %v1692_v27, %v1692_v27  ;;  %v2137_v13 = vld [vmem:[#allocation2 + $0x270] sm:$0xff]   ;;  %v2140_v11 = vld [vmem:[#allocation2 + $0x288] sm:$0xff]   ;;  %v1759_v21 = vld [vmem:[%s2592_s2 + $0x1] ss:$0 sm:$0xff] }
  0xd4   :  { %v256_v0 = vadd.bf16 %v248_v26, %v212_v40  ;;  %v2141_v40 = vld [vmem:[#allocation2 + $0x290] sm:$0xff]   ;;  %v2142_v26 = vld [vmem:[#allocation2 + $0x298] sm:$0xff]  }
  0xd5   :  { %1020 = vmatmul.mubr.bf16.vlgmr.msra.gmra.mrb[4].mxu0 %v386_v19  ;;  %v2144_v19 = vld [vmem:[#allocation2 + $0x2a8] sm:$0xff]  }
  0xd6   :  { %1881 = vmatpush3.bf16.msra.mxu1 %v2114_v18  ;;  %v300_v28 = vadd.bf16 %v292_v20, %v256_v0  ;;  %1938 = vmatpush3.bf16.msra.mxu0 %v2123_v53  ;;  %v2143_v18 = vld [vmem:[#allocation2 + $0x2a0] sm:$0xff]  }
  0xd7   :  { %1882 = vmatprep.subr.bf16.mxu1 %v2116_v22  ;;  %1939 = vmatprep.subr.bf16.mxu0 %v2198_v57  ;;  %v2151_v53 = vld [vmem:[#allocation2 + $0x2e0] sm:$0xff]  }
  0xd8   :  { %v344_v54 = vadd.bf16 %v336_v29, %v300_v28  ;;  %1953 = vmatprep.mubr.msk.bf16.mxu0 %vm2199_vm0, %v2198_v57  ;;  %v2145_v28 = vld [vmem:[#allocation2 + $0x2b0] sm:$0xff]   ;;  %v2146_v29 = vld [vmem:[#allocation2 + $0x2b8] sm:$0xff]  }
  0xda   :  { %1883 = vmatpush3.bf16.msra.mxu1 %v2118_v23  ;;  %v388_v31 = vadd.bf16 %v380_v43, %v344_v54  ;;  %1940 = vmatpush3.bf16.msra.mxu0 %v2124_v16  ;;  %v2148_v43 = vld [vmem:[#allocation2 + $0x2c8] sm:$0xff]   ;;  %v2149_v54 = vld [vmem:[#allocation2 + $0x2d0] sm:$0xff]  }
  0xdb   :  { %1884 = vmatprep.subr.bf16.mxu1 %v2120_v25  ;;  %1941 = vmatprep.subr.bf16.mxu0 %v2198_v57  ;;  %v2152_v16 = vld [vmem:[#allocation2 + $0x2e8] sm:$0xff]  }
  0xde   :  { %1885 = vmatpush3.bf16.msra.mxu1 %v2122_v30  ;;  %1942 = vmatpush3.bf16.msra.mxu0 %v2125_v55  ;;  %v2147_v30 = vld [vmem:[#allocation2 + $0x2c0] sm:$0xff]  }
  0xdf   :  { %1957 = vmatprep.subr.bf16.mxu1 %v2198_v57  ;;  %1943 = vmatprep.subr.bf16.mxu0 %v2198_v57  ;;  %v1768_v55 = vld [vmem:[%s2592_s2 + $0x2] ss:$0 sm:$0xff] }
  0xe1   :  { %1060 = vmatmul.mubr.bf16.vlgmr.msra.gmra.mrb[4].mxu1 %v388_v31  ;;  %v2150_v31 = vld [vmem:[#allocation2 + $0x2d8] sm:$0xff]  }
  0xe2   :  { %1944 = vmatpush3.bf16.msra.mxu0 %v2126_v2  ;;  %1973 = vmatprep.mubr.msk.bf16.mxu1 %vm2199_vm0, %v2198_v57 }
  0xe3   :  { %1945 = vmatprep.subr.bf16.mxu0 %v2198_v57  ;;  %1958 = vmatpush3.bf16.msra.mxu1 %v2131_v33 }
  0xe4   :  { %1959 = vmatprep.subr.bf16.mxu1 %v2198_v57 }
  0xe6   :  { %1946 = vmatpush3.bf16.msra.mxu0 %v2127_v58 }
  0xe7   :  { %1947 = vmatprep.subr.bf16.mxu0 %v2198_v57  ;;  %1960 = vmatpush3.bf16.msra.mxu1 %v2132_v34 }
  0xe8   :  { %1961 = vmatprep.subr.bf16.mxu1 %v2198_v57 }
  0xea   :  { %1948 = vmatpush3.bf16.msra.mxu0 %v2128_v63 }
  0xeb   :  { %1949 = vmatprep.subr.bf16.mxu0 %v2198_v57  ;;  %1962 = vmatpush3.bf16.msra.mxu1 %v2133_v10  ;;  %v2153_v10 = vld [vmem:[#allocation2 + $0x2f0] sm:$0xff]  }
  0xec   :  { %1963 = vmatprep.subr.bf16.mxu1 %v2198_v57 }
  0xee   :  { %1950 = vmatpush3.bf16.msra.mxu0 %v2129_v32 }
  0xef   :  { %1951 = vmatprep.subr.bf16.mxu0 %v2198_v57  ;;  %1964 = vmatpush3.bf16.msra.mxu1 %v2134_v14  ;;  %v2154_v14 = vld [vmem:[#allocation2 + $0x2f8] sm:$0xff]  }
  0xf0   :  { %1965 = vmatprep.subr.bf16.mxu1 %v2198_v57 }
  0xf2   :  { %1952 = vmatpush3.bf16.msra.mxu0 %v2130_v35 }
  0xf3   :  { %1977 = vmatprep.subr.bf16.mxu0 %v2198_v57  ;;  %1966 = vmatpush3.bf16.msra.mxu1 %v2135_v36  ;;  %v2155_v36 = vld [vmem:[#allocation2 + $0x300] sm:$0xff]  }
  0xf4   :  { %1967 = vmatprep.subr.bf16.mxu1 %v2198_v57 }
  0xf7   :  { %1968 = vmatpush3.bf16.msra.mxu1 %v2136_v37  ;;  %v2156_v37 = vld [vmem:[#allocation2 + $0x308] sm:$0xff]  }
  0xf8   :  { %1969 = vmatprep.subr.bf16.mxu1 %v2198_v57 }
  0xfb   :  { %1970 = vmatpush3.bf16.msra.mxu1 %v2137_v13 }
  0xfc   :  { %1971 = vmatprep.subr.bf16.mxu1 %v2198_v57 }
  0xff   :  { %1972 = vmatpush3.bf16.msra.mxu1 %v2138_v15 }
 0x100   :  { %1997 = vmatprep.subr.bf16.mxu1 %v2198_v57 }
 0x188   :  { %v1820_v51 = vpop.f32.mrb[0].mxu0 }
 0x189   :  { %v1821_v38 = vpop.f32.mrb[1].mxu0 }
 0x18a   :  { %v1822_v39 = vadd.f32 %v1821_v38, %v1820_v51  ;;  %v1823_v41 = vpop.f32.mrb[2].mxu0  ;;  %v2157_v51 = vld [vmem:[#allocation2 + $0x310] sm:$0xff]   ;;  %v2158_v38 = vld [vmem:[#allocation2 + $0x318] sm:$0xff]  }
 0x18b   :  { %v1824_v42 = vpop.f32.mrb[3].mxu0  ;;  %v2160_v41 = vld [vmem:[#allocation2 + $0x328] sm:$0xff]  }
 0x18c   :  { %v942_v45 = vadd.f32 %v1822_v39, %v1694_v44  ;;  %v2159_v39 = vld [vmem:[#allocation2 + $0x320] sm:$0xff]  }
 0x18d   :  { %v1777_v42 = vld [vmem:[%s2592_s2 + $0x3] ss:$0 sm:$0xff] }
 0x194   :  { %v1842_v1 = vpop.f32.mrb[0].mxu1 }
 0x195   :  { %v1843_v46 = vpop.f32.mrb[1].mxu1 }
 0x196   :  { %v1844_v47 = vadd.f32 %v1843_v46, %v1842_v1  ;;  %v1845_v48 = vpop.f32.mrb[2].mxu1 }
 0x197   :  { %v1846_v49 = vpop.f32.mrb[3].mxu1 }
 0x198   :  { %v982_v56 = vadd.f32 %v1844_v47, %v942_v45 }
 0x1a8   :  { %v1864_v50 = vpop.f32.mrb[4].mxu0 }
 0x1a9   :  { %v1865_v52 = vpop.f32.mrb[5].mxu0 }
 0x1aa   :  { %v1866_v61 = vadd.f32 %v1865_v52, %v1864_v50  ;;  %v1867_v62 = vpop.f32.mrb[6].mxu0  ;;  %v2161_v50 = vld [vmem:[#allocation2 + $0x330] sm:$0xff]   ;;  %v2162_v52 = vld [vmem:[#allocation2 + $0x338] sm:$0xff]  }
 0x1ab   :  { %v1868_v5 = vpop.f32.mrb[7].mxu0 }
 0x1ac   :  { %v1022_v4 = vadd.f32 %v1866_v61, %v982_v56  ;;  %v1786_v61 = vld [vmem:[%s2592_s2 + $0x4] ss:$0 sm:$0xff] }
 0x1b4   :  { %v1886_v6 = vpop.f32.mrb[4].mxu1 }
 0x1b5   :  { %v1887_v59 = vpop.f32.mrb[5].mxu1 }
 0x1b6   :  { %v1888_v3 = vadd.f32 %v1887_v59, %v1886_v6  ;;  %v1889_v60 = vpop.f32.mrb[6].mxu1 }
 0x1b7   :  { %v1890_v7 = vpop.f32.mrb[7].mxu1 }
 0x1b8   :  { %v1062_v12 = vadd.f32 %v1888_v3, %v1022_v4 }
 0x1ba   :  { %v2532_v8 = vmax.f32 %v1062_v12, 0.0  ;;  %v1795_v12 = vld [vmem:[%s2592_s2 + $0x5] ss:$0 sm:$0xff] }
 0x1bc   :  { %v1085_v9 = vpack.c.bf16 %v2532_v8, %v2532_v8 }
 0x1be   :  { %1954 = vmatmul.mubr.bf16.vlgmr.msra.gmra.mrb[8].mxu0 %v1085_v9 }
 0x1bf   :  { %1993 = vmatprep.mubr.msk.bf16.mxu0 %vm2199_vm0, %v2198_v57  ;;  %1978 = vmatpush3.bf16.msra.mxu0 %v2139_v17 }
 0x1c0   :  { %1979 = vmatprep.subr.bf16.mxu0 %v2198_v57 }
 0x1c3   :  { %1980 = vmatpush3.bf16.msra.mxu0 %v2140_v11 }
 0x1c4   :  { %1981 = vmatprep.subr.bf16.mxu0 %v2198_v57 }
 0x1c7   :  { %1982 = vmatpush3.bf16.msra.mxu0 %v2141_v40 }
 0x1c8   :  { %1983 = vmatprep.subr.bf16.mxu0 %v2198_v57 }
 0x1cb   :  { %1984 = vmatpush3.bf16.msra.mxu0 %v2142_v26 }
 0x1cc   :  { %1985 = vmatprep.subr.bf16.mxu0 %v2198_v57 }
 0x1cf   :  { %1986 = vmatpush3.bf16.msra.mxu0 %v2143_v18 }
 0x1d0   :  { %1987 = vmatprep.subr.bf16.mxu0 %v2198_v57 }
 0x1d3   :  { %1988 = vmatpush3.bf16.msra.mxu0 %v2144_v19 }
 0x1d4   :  { %1989 = vmatprep.subr.bf16.mxu0 %v2198_v57 }
 0x1d7   :  { %1990 = vmatpush3.bf16.msra.mxu0 %v2145_v28 }
 0x1d8   :  { %1991 = vmatprep.subr.bf16.mxu0 %v2198_v57 }
 0x1db   :  { %1992 = vmatpush3.bf16.msra.mxu0 %v2146_v29 }
 0x1dc   :  { %2017 = vmatprep.subr.bf16.mxu0 %v2198_v57 }
 0x291   :  { %v1172_v22 = vpop.f32.mrb[8].mxu0 }
 0x292   :  { %v1173_v0 = vadd.f32 %v1759_v21, %v1172_v22  ;;  %v1955_v20 = vpop.f32.mrb[9].mxu0 }
 0x293   :  { %v1175_v23 = vpop.f32.mrb[10].mxu0 }
 0x294   :  { %v2549_v24 = vmax.f32 %v1173_v0, 0.0  ;;  %v1956_v25 = vpop.f32.mrb[11].mxu0 }
 0x296   :  { %v1196_v27 = vpack.c.bf16 %v2549_v24, %v2549_v24 }
 0x298   :  { %1974 = vmatmul.mubr.bf16.vlgmr.msra.gmra.mrb[8].mxu1 %v1196_v27 }
 0x299   :  { %2013 = vmatprep.mubr.msk.bf16.mxu1 %vm2199_vm0, %v2198_v57  ;;  %1998 = vmatpush3.bf16.msra.mxu1 %v2147_v30 }
 0x29a   :  { %1999 = vmatprep.subr.bf16.mxu1 %v2198_v57 }
 0x29d   :  { %2000 = vmatpush3.bf16.msra.mxu1 %v2148_v43 }
 0x29e   :  { %2001 = vmatprep.subr.bf16.mxu1 %v2198_v57 }
 0x2a1   :  { %2002 = vmatpush3.bf16.msra.mxu1 %v2149_v54 }
 0x2a2   :  { %2003 = vmatprep.subr.bf16.mxu1 %v2198_v57 }
 0x2a5   :  { %2004 = vmatpush3.bf16.msra.mxu1 %v2150_v31 }
 0x2a6   :  { %2005 = vmatprep.subr.bf16.mxu1 %v2198_v57 }
 0x2a9   :  { %2006 = vmatpush3.bf16.msra.mxu1 %v2151_v53 }
 0x2aa   :  { %2007 = vmatprep.subr.bf16.mxu1 %v2198_v57 }
 0x2ad   :  { %2008 = vmatpush3.bf16.msra.mxu1 %v2152_v16 }
 0x2ae   :  { %2009 = vmatprep.subr.bf16.mxu1 %v2198_v57 }
 0x2b1   :  { %2010 = vmatpush3.bf16.msra.mxu1 %v2153_v10 }
 0x2b2   :  { %2011 = vmatprep.subr.bf16.mxu1 %v2198_v57 }
 0x2b5   :  { %2012 = vmatpush3.bf16.msra.mxu1 %v2154_v14 }
 0x36b   :  { %v1283_v2 = vpop.f32.mrb[8].mxu1 }
 0x36c   :  { %v1284_v58 = vadd.f32 %v1768_v55, %v1283_v2  ;;  %v1975_v63 = vpop.f32.mrb[9].mxu1 }
 0x36d   :  { %v1286_v32 = vpop.f32.mrb[10].mxu1 }
 0x36e   :  { %v1289_v33 = vmax.f32 %v1284_v58, 0.0  ;;  %v1976_v34 = vpop.f32.mrb[11].mxu1 }
 0x370   :  { %v1307_v35 = vpack.c.bf16 %v1289_v33, %v1289_v33 }
 0x372   :  { %1994 = vmatmul.mubr.bf16.vlgmr.msra.gmra.mrb[12].mxu0 %v1307_v35 }
 0x373   :  { %2033 = vmatprep.mubr.msk.bf16.mxu0 %vm2199_vm0, %v2198_v57  ;;  %2018 = vmatpush3.bf16.msra.mxu0 %v2155_v36 }
 0x374   :  { %2019 = vmatprep.subr.bf16.mxu0 %v2198_v57 }
 0x377   :  { %2020 = vmatpush3.bf16.msra.mxu0 %v2156_v37 }
 0x378   :  { %2021 = vmatprep.subr.bf16.mxu0 %v2198_v57 }
 0x37b   :  { %2022 = vmatpush3.bf16.msra.mxu0 %v2157_v51 }
 0x37c   :  { %2023 = vmatprep.subr.bf16.mxu0 %v2198_v57 }
 0x37f   :  { %2024 = vmatpush3.bf16.msra.mxu0 %v2158_v38 }
 0x380   :  { %2025 = vmatprep.subr.bf16.mxu0 %v2198_v57 }
 0x383   :  { %2026 = vmatpush3.bf16.msra.mxu0 %v2159_v39 }
 0x384   :  { %2027 = vmatprep.subr.bf16.mxu0 %v2198_v57 }
 0x387   :  { %2028 = vmatpush3.bf16.msra.mxu0 %v2160_v41 }
 0x388   :  { %2029 = vmatprep.subr.bf16.mxu0 %v2198_v57 }
 0x38b   :  { %2030 = vmatpush3.bf16.msra.mxu0 %v2161_v50 }
 0x38c   :  { %2031 = vmatprep.subr.bf16.mxu0 %v2198_v57 }
 0x38f   :  { %2032 = vmatpush3.bf16.msra.mxu0 %v2162_v52 }
 0x445   :  { %v1394_v44 = vpop.f32.mrb[12].mxu0 }
 0x446   :  { %v1395_v1 = vadd.f32 %v1777_v42, %v1394_v44  ;;  %v1995_v45 = vpop.f32.mrb[13].mxu0 }
 0x447   :  { %v1397_v46 = vpop.f32.mrb[14].mxu0 }
 0x448   :  { %v1400_v47 = vadd.f32 %v1395_v1, %v2549_v24  ;;  %v1996_v48 = vpop.f32.mrb[15].mxu0 }
 0x44a   :  { %v1401_v49 = vmax.f32 %v1400_v47, 0.0 }
 0x44c   :  { %v1419_v56 = vpack.c.bf16 %v1401_v49, %v1401_v49 }
 0x44e   :  { %2014 = vmatmul.mubr.bf16.vlgmr.msra.gmra.mrb[12].mxu1 %v1419_v56 }
 0x521   :  { %v1506_v62 = vpop.f32.mrb[12].mxu1 }
 0x522   :  { %v1507_v5 = vadd.f32 %v1786_v61, %v1506_v62  ;;  %v2015_v4 = vpop.f32.mrb[13].mxu1 }
 0x523   :  { %v1509_v6 = vpop.f32.mrb[14].mxu1 }
 0x524   :  { %v1512_v59 = vadd.f32 %v1507_v5, %v2532_v8  ;;  %v2016_v3 = vpop.f32.mrb[15].mxu1 }
 0x526   :  { %v1513_v60 = vmax.f32 %v1512_v59, 0.0 }
 0x528   :  { %v1531_v7 = vpack.c.bf16 %v1513_v60, %v1513_v60 }
 0x52a   :  { %2034 = vmatmul.mubr.bf16.vlgmr.msra.gmra.mrb[16].mxu0 %v1531_v7 }
 0x5fd   :  { %v1618_v57 = vpop.f32.mrb[16].mxu0 }
 0x5fe   :  { %v1619_v9 = vadd.f32 %v1795_v12, %v1618_v57  ;;  %v2035_v13 = vpop.f32.mrb[17].mxu0 }
 0x5ff   :  { %v1621_v15 = vpop.f32.mrb[18].mxu0 }
 0x600   :  { %1624 = vst [vmem:[%s2593_s3] sm:$0xff] %v1619_v9  ;;  %v2036_v17 = vpop.f32.mrb[19].mxu0 }
 0x601   :  { %1629 = vsyncpa [#allocation3], 1 }

</bundles_post_ra>
